<compile_context>
chip_gen: v6e
topology: v6e:2x2x1
jax: 0.10.0
libtpu: 0.0.40
codegen_flags: <defaults>
</compile_context>

<pallas_src>
import functools
import math

import jax
import jax.numpy as jnp
from jax.experimental import pallas as pl
from jax.experimental.pallas import tpu as pltpu


def _attention_head_kernel(x_ref, w_ref, o_ref, *, t, h):
    """One grid step = one block of bb batch elements.

    x_ref : (bb*t, c)  bf16 input embeddings, (batch, time) flattened on sublanes
    w_ref : (3h, c)    bf16 q/k/v projection weights, native nn.Linear layout
    o_ref : (bb, t*h)  f32 lane-dense output
    """
    bt, c = x_ref.shape
    bb = bt // t
    scale = 1.0 / math.sqrt(h)  # k.shape[-1] ** -0.5

    x2 = x_ref[...]            # (bb*t, c) bf16, MXU-native, no in-kernel cast
    w = w_ref[...]             # (3h, c)  bf16, resident across grid steps

    # Single fused projection: y = x @ W.T expressed as a contraction over C
    # (no materialized transpose), N = 3H in one MXU pass, f32 accumulation.
    qkv = jax.lax.dot_general(
        x2, w, (((1,), (1,)), ((), ())),
        preferred_element_type=jnp.float32)                  # (bb*t, 3h)

    # Scale q (B*T*H elements) instead of the (T, T) score matrix.  Reshape in
    # f32 (before the bf16 cast) so no packed-sublane relayout is triggered.
    q = (qkv[:, 0:h] * scale).reshape(bb, t, h).astype(jnp.bfloat16)
    k = qkv[:, h:2 * h].reshape(bb, t, h).astype(jnp.bfloat16)
    v = qkv[:, 2 * h:3 * h].reshape(bb, t, h).astype(jnp.bfloat16)

    # Batched q @ k^T contracting over H directly (no k transpose / XLU pass).
    scores = jax.lax.dot_general(
        q, k, (((2,), (2,)), ((0,), (0,))),
        preferred_element_type=jnp.float32)                  # (bb, t, t)

    # Causal mask, built once per grid step for the whole batch block.
    row_ids = jax.lax.broadcasted_iota(jnp.int32, (t, t), 0)
    col_ids = jax.lax.broadcasted_iota(jnp.int32, (t, t), 1)
    causal = col_ids <= row_ids
    scores = jnp.where(causal, scores, jnp.float32(-1e30))   # large-finite mask

    # Numerically stable softmax in f32 (matches torch.softmax; keeps v5e off
    # emulated bf16 vector math).  1/sum via the EUP vrcp (free slot).
    m = jnp.max(scores, axis=-1, keepdims=True)
    e = jnp.exp(scores - m)
    s = jnp.sum(e, axis=-1, keepdims=True)
    p = e * pl.reciprocal(s, approx=True)

    # TODO(synk): nn.Dropout on `p` is identity in eval mode; training-mode
    # dropout (torch RNG) has no bit-exact Pallas equivalent and is omitted.

    out = jax.lax.dot_general(
        p.astype(jnp.bfloat16), v, (((2,), (1,)), ((0,), (0,))),
        preferred_element_type=jnp.float32)                  # (bb, t, h)

    # Lane-dense store: (bb, t*h) is a whole multiple of 128 lanes at t=8, h=16.
    o_ref[...] = out.reshape(bb, t * h).astype(o_ref.dtype)


def _block_vmem_bytes(bb, t, c, h):
    """Rough per-grid-step VMEM footprint (double-buffered I/O + intermediates)."""
    bf16, f32 = 2, 4
    return (2 * bb * t * c * bf16        # x block, double buffered
            + 3 * h * c * bf16           # resident qkv weights
            + 2 * bb * t * h * f32       # out block, double buffered
            + bb * t * t * f32           # f32 scores
            + 4 * bb * t * 3 * h * f32)  # qkv + q/k/v copies (generous margin)


def _pick_num_batch_blocks(b, t, c, h):
    """Generation-aware grid sizing.

    v5e/v6e have a single TensorCore: one grid step (per-step fixed cost and
    DMA setup dominate at this scale).  v7x has two TensorCores: use 2
    "parallel" steps when the batch is large enough that each block stays
    sublane-aligned (bb % 8 == 0).  Blocks are shrunk (grid grown) only if the
    per-step working set overflows a ~40 MiB budget of v7x's 64 MiB VMEM.
    """
    try:
        kind = jax.devices()[0].device_kind.lower()
    except Exception:  # defensive: fall back to single-core behaviour
        kind = ""
    num_cores = 2 if "v7" in kind else 1

    nb = 2 if (num_cores >= 2 and b % 16 == 0) else 1
    budget = 40 * 1024 * 1024
    while _block_vmem_bytes(b // nb, t, c, h) > budget and (b // nb) % 16 == 0:
        nb *= 2
    return nb


def self_attention_head(x, w_query, w_key, w_value, *, num_batch_blocks=None):
    """Pallas forward pass for SelfAttentionHead (eval mode).

    Args:
      x: (B, T, C) input embeddings.
      w_query/w_key/w_value: (H, C) weights in PyTorch nn.Linear layout
        (out_features, in_features); y = x @ W.T (no wrapper transposes).
      num_batch_blocks: optional override for the number of grid steps along
        the batch axis (default: generation/VMEM-aware).

    Returns:
      (B, T, H) float32 attention output.
    """
    b, t, c = x.shape
    h = w_query.shape[0]

    if num_batch_blocks is None:
        num_batch_blocks = _pick_num_batch_blocks(b, t, c, h)
    nb = max(1, min(num_batch_blocks, b))
    bb = pl.cdiv(b, nb)            # batch elements per grid step
    b_pad = bb * nb

    # Zero-pad the batch so no grid block reads past the edge (zero rows are
    # numerically safe through the masked softmax; they are dropped below).
    if b_pad != b:
        x = jnp.pad(x, ((0, b_pad - b), (0, 0), (0, 0)))

    # bf16 end-to-end I/O; flatten (B, T) onto sublanes in the wrapper so the
    # kernel never does an in-kernel relayout.
    x_bf = jnp.asarray(x, jnp.bfloat16).reshape(b_pad * t, c)

    # Single resident (3H, C) weight buffer: one DMA, one fused projection.
    w_qkv = jnp.concatenate(
        [jnp.asarray(w_query, jnp.bfloat16),
         jnp.asarray(w_key, jnp.bfloat16),
         jnp.asarray(w_value, jnp.bfloat16)], axis=0)

    # Raise the scoped-VMEM limit only when the working set needs it.
    footprint = _block_vmem_bytes(bb, t, c, h)
    vmem_limit = None
    if footprint > 24 * 1024 * 1024:
        vmem_limit = min(int(1.5 * footprint), 48 * 1024 * 1024)

    grid_spec = pltpu.PrefetchScalarGridSpec(
        num_scalar_prefetch=0,
        grid=(nb,),
        in_specs=[
            pl.BlockSpec((bb * t, c), lambda i: (i, 0)),
            # Grid-invariant weights: DMA'd once, kept resident in VMEM.
            pl.BlockSpec((3 * h, c), lambda i: (0, 0)),
        ],
        out_specs=pl.BlockSpec((bb, t * h), lambda i: (i, 0)),
    )

    out = pl.pallas_call(
        functools.partial(_attention_head_kernel, t=t, h=h),
        out_shape=jax.ShapeDtypeStruct((b_pad, t * h), jnp.float32),
        grid_spec=grid_spec,
        compiler_params=pltpu.CompilerParams(
            dimension_semantics=("parallel",),
            vmem_limit_bytes=vmem_limit,
        ),
    )(x_bf, w_qkv)

    # Lane-dense (B, T*H) -> (B, T, H): free XLA layout plumbing.
    return out[:b].reshape(b, t, h)


def _reference(x, w_query, w_key, w_value):
    """Pure-JAX f32 reference mirroring the PyTorch forward (eval mode)."""
    q = x @ w_query.T
    k = x @ w_key.T
    v = x @ w_value.T
    t = x.shape[1]
    wei = (q @ jnp.swapaxes(k, -2, -1)) * (k.shape[-1] ** -0.5)
    tril = jnp.tril(jnp.ones((t, t), dtype=bool))
    wei = jnp.where(tril, wei, -jnp.inf)
    wei = jax.nn.softmax(wei, axis=-1)
    return wei @ v


if __name__ == "__main__":
    # Module hyperparameters (synthetic, deterministic).
    n_embd = 32       # channels C
    head_size = 16    # H
    block_size = 8    # max T (tril buffer size)
    batch = 2
    seq = 8           # t == block_size here

    key = jax.random.PRNGKey(0)
    kx, kq, kk, kv = jax.random.split(key, 4)

    x = jax.random.normal(kx, (batch, seq, n_embd), dtype=jnp.float32)
    # nn.Linear(n_embd, head_size, bias=False) weights: shape (head_size, n_embd)
    bound = 1.0 / math.sqrt(n_embd)
    w_query = jax.random.uniform(kq, (head_size, n_embd), jnp.float32, -bound, bound)
    w_key = jax.random.uniform(kk, (head_size, n_embd), jnp.float32, -bound, bound)
    w_value = jax.random.uniform(kv, (head_size, n_embd), jnp.float32, -bound, bound)

    out = self_attention_head(x, w_query, w_key, w_value)
    out = jax.block_until_ready(out)

    ref = _reference(x, w_query, w_key, w_value)
    assert out.shape == (batch, seq, head_size)
    # bf16 I/O + bf16 MXU operands with f32 accumulation -> loosened tolerance
    # vs. the pure-f32 reference (accepted numeric contract).
    max_err = jnp.max(jnp.abs(out - ref))
    assert jnp.allclose(out, ref, atol=5e-2, rtol=5e-2), f"max abs err {max_err}"
    print("KERNEL_OK")
</pallas_src>

<mosaic_0001>
module attributes {stable_mosaic.version = 11 : i64} {
  func.func @_attention_head_kernel(%arg0: i32, %arg1: memref<16x32xbf16, #tpu.memory_space<vmem>>, %arg2: memref<48x32xbf16, #tpu.memory_space<vmem>>, %arg3: memref<2x128xf32, #tpu.memory_space<vmem>>) attributes {dimension_semantics = [#tpu.dimension_semantics<parallel>], iteration_bounds = array<i64: 1>, scalar_prefetch = 0 : i64, scratch_operands = 0 : i64, tpu.core_type = #tpu.core_type<tc>, window_params = [{transform_indices = @transform_0, window_bounds = array<i64: 16, 32>}, {pipeline_mode = #tpu.pipeline_mode<synchronous>, transform_indices = @transform_1, window_bounds = array<i64: 48, 32>}, {transform_indices = @transform_2, window_bounds = array<i64: 2, 128>}]} {
    %c0 = arith.constant 0 : index
    %c0_0 = arith.constant 0 : index
    %0 = vector.load %arg1[%c0, %c0_0] : memref<16x32xbf16, #tpu.memory_space<vmem>>, vector<16x32xbf16>
    %c0_1 = arith.constant 0 : index
    %c0_2 = arith.constant 0 : index
    %1 = vector.load %arg2[%c0_1, %c0_2] : memref<48x32xbf16, #tpu.memory_space<vmem>>, vector<48x32xbf16>
    %cst = arith.constant dense<0.000000e+00> : vector<16x48xf32>
    %2 = tpu.matmul %0, %1, %cst {dimension_numbers = #tpu.dot_dimension_numbers<[1], [1], [0], [0], [0, 0, 1, 0], [], []>} : vector<16x32xbf16>, vector<48x32xbf16>, vector<16x48xf32> -> vector<16x48xf32>
    %3 = vector.extract_strided_slice %2 {offsets = [0, 0], sizes = [16, 16], strides = [1, 1]} : vector<16x48xf32> to vector<16x16xf32>
    %cst_3 = arith.constant 2.500000e-01 : f32
    %4 = vector.broadcast %cst_3 : f32 to vector<16x16xf32>
    %5 = arith.mulf %3, %4 : vector<16x16xf32>
    %6 = vector.shape_cast %5 : vector<16x16xf32> to vector<2x8x16xf32>
    %7 = arith.truncf %6 : vector<2x8x16xf32> to vector<2x8x16xbf16>
    %8 = vector.extract_strided_slice %2 {offsets = [0, 16], sizes = [16, 16], strides = [1, 1]} : vector<16x48xf32> to vector<16x16xf32>
    %9 = vector.shape_cast %8 : vector<16x16xf32> to vector<2x8x16xf32>
    %10 = arith.truncf %9 : vector<2x8x16xf32> to vector<2x8x16xbf16>
    %11 = vector.extract_strided_slice %2 {offsets = [0, 32], sizes = [16, 16], strides = [1, 1]} : vector<16x48xf32> to vector<16x16xf32>
    %12 = vector.shape_cast %11 : vector<16x16xf32> to vector<2x8x16xf32>
    %13 = arith.truncf %12 : vector<2x8x16xf32> to vector<2x8x16xbf16>
    %cst_4 = arith.constant dense<0.000000e+00> : vector<2x8x8xf32>
    %14 = tpu.matmul %7, %10, %cst_4 {dimension_numbers = #tpu.dot_dimension_numbers<[2], [2], [1], [1], [0, 0, 0, 1, 1, 1], [0], [0]>} : vector<2x8x16xbf16>, vector<2x8x16xbf16>, vector<2x8x8xf32> -> vector<2x8x8xf32>
    %15 = tpu.iota {dimensions = array<i32: 0>} : vector<8x8xi32>
    %16 = tpu.iota {dimensions = array<i32: 1>} : vector<8x8xi32>
    %17 = arith.cmpi sle, %16, %15 : vector<8x8xi32>
    %cst_5 = arith.constant -1.000000e+30 : f32
    %18 = vector.shape_cast %17 : vector<8x8xi1> to vector<1x8x8xi1>
    %19 = vector.broadcast %18 : vector<1x8x8xi1> to vector<2x8x8xi1>
    %20 = vector.broadcast %cst_5 : f32 to vector<2x8x8xf32>
    %21 = arith.select %19, %14, %20 : vector<2x8x8xi1>, vector<2x8x8xf32>
    %cst_6 = arith.constant dense<0xFF800000> : vector<2x8xf32>
    %22 = vector.multi_reduction <maximumf>, %21, %cst_6 [2] : vector<2x8x8xf32> to vector<2x8xf32>
    %23 = vector.shape_cast %22 : vector<2x8xf32> to vector<2x8x1xf32>
    %24 = vector.broadcast %23 : vector<2x8x1xf32> to vector<2x8x8xf32>
    %25 = arith.subf %21, %24 : vector<2x8x8xf32>
    %26 = math.exp %25 : vector<2x8x8xf32>
    %cst_7 = arith.constant dense<0.000000e+00> : vector<2x8xf32>
    %27 = vector.multi_reduction <add>, %26, %cst_7 [2] : vector<2x8x8xf32> to vector<2x8xf32>
    %28 = vector.shape_cast %27 : vector<2x8xf32> to vector<2x8x1xf32>
    %29 = tpu.reciprocal %28 {approx = true} : vector<2x8x1xf32> -> vector<2x8x1xf32>
    %30 = vector.broadcast %29 : vector<2x8x1xf32> to vector<2x8x8xf32>
    %31 = arith.mulf %26, %30 : vector<2x8x8xf32>
    %32 = arith.truncf %31 : vector<2x8x8xf32> to vector<2x8x8xbf16>
    %cst_8 = arith.constant dense<0.000000e+00> : vector<2x8x16xf32>
    %33 = tpu.matmul %32, %13, %cst_8 {dimension_numbers = #tpu.dot_dimension_numbers<[2], [1], [1], [2], [0, 0, 0, 1, 1, 2], [0], [0]>} : vector<2x8x8xbf16>, vector<2x8x16xbf16>, vector<2x8x16xf32> -> vector<2x8x16xf32>
    %34 = vector.shape_cast %33 : vector<2x8x16xf32> to vector<2x128xf32>
    %c0_9 = arith.constant 0 : index
    %c0_10 = arith.constant 0 : index
    %35 = vector.load %arg3[%c0_9, %c0_10] : memref<2x128xf32, #tpu.memory_space<vmem>>, vector<2x128xf32>
    tpu.vector_store %arg3[%c0_9, %c0_10], %34 {strides = array<i32>} : memref<2x128xf32, #tpu.memory_space<vmem>>, vector<2x128xf32>,
    return
  }
  func.func @transform_0(%arg0: i32) -> (i32, i32) {
    %c0_i32 = arith.constant 0 : i32
    %c0_i32_0 = arith.constant 0 : i32
    return %arg0, %c0_i32 : i32, i32
  }
  func.func @transform_1(%arg0: i32) -> (i32, i32) {
    %c0_i32 = arith.constant 0 : i32
    %c0_i32_0 = arith.constant 0 : i32
    %c0_i32_1 = arith.constant 0 : i32
    return %c0_i32, %c0_i32_0 : i32, i32
  }
  func.func @transform_2(%arg0: i32) -> (i32, i32) {
    %c0_i32 = arith.constant 0 : i32
    %c0_i32_0 = arith.constant 0 : i32
    return %arg0, %c0_i32 : i32, i32
  }
}

</mosaic_0001>

<bundles_post_ra>
// kernel: tpu_custom_call.1
= control target key start
LH: loop header
LB: loop body
LE: loop exit
PB: predicated region body
PF: predicated region fallthrough
CT: control target
= control target key end

     0   :  { %v553_v1 = vmov 0.0   ;;  %vm41_vm0 = vcmask 261120   ;;  %vm554_vm1 = vmmov 0   ;;  %s647_s0 = inlined_call_operand.vmem [shape: bf16[16,32], index: 0, kind: input, shape index: {}]   ;;  %s648_s1 = inlined_call_operand.vmem [shape: bf16[48,32], index: 1, kind: input, shape index: {}]   ;;  %s649_s2 = inlined_call_operand.hbm [shape: f32[2,128], index: 2, kind: output, shape index: {}]  }
   0x1   :  { %v519_v0 = vld [vmem:[%s648_s1 + $0x10] sm:$0xff]   ;;  %473 = vmatprep.subr.bf16.mxu0 %v553_v1  ;;  %483 = vmatprep.subr.bf16.mxu1 %v553_v1  ;;  %v520_v3 = vld [vmem:[%s648_s1 + $0x8] sm:$0xff]  }
   0x2   :  { %v52_v2 = vsel %vm41_vm0, %v519_v0, 0  ;;  %479 = vmatprep.mubr.msk.bf16.mxu0 %vm554_vm1, %v553_v1 }
   0x3   :  { %474 = vmatpush3.bf16.xpose.msra.mxu0 %v52_v2 }
   0x4   :  { %475 = vmatprep.subr.bf16.mxu0 %v553_v1 }
   0x5   :  { %7 = vsyncpa [#allocation3], 0  ;;  %485 = vmatprep.mubr.msk.bf16.mxu1 %vm554_vm1, %v553_v1  ;;  %v49_v4 = vsel %vm41_vm0, %v520_v3, 0  ;;  %v521_v5 = vld [vmem:[%s648_s1] sm:$0xff]   ;;  %s555_s17 = smov 112   ;;  %vm104_vm2 = vcmask 130048   ;;  %v200_v22 = vlaneseq }
   0x6   :  { %v46_v6 = vsel %vm41_vm0, %v521_v5, 0  ;;  %v522_v7 = vld [vmem:[%s647_s0] sm:$0xff]   ;;  %vm209_vm4 = vcmask 64512   ;;  %s556_s0 = smov 96   ;;  %vm239_vm5 = vcmask 1043456   ;;  %s559_s1 = smov 32  }
   0x7   :  { %v619_v23 = vshrl.u32 %v200_v22, 7  ;;  %v203_v24 = vand.u32 127, %v200_v22  ;;  %v557_v59 = vmov 1983009808   ;;  %v558_v62 = vmov 1934713408  }
   0x8   :  { %v333_v60 = vunpack.c.l.s4 %v557_v59  ;;  %v364_v63 = vunpack.c.l.s4 %v558_v62  ;;  %s560_s18 = smov 48   ;;  %s561_s19 = smov 16   ;;  %vm427_vm6 = vcmask 392192   ;;  %vm429_vm7 = vcmask 523264  }
   0x9   :  { %vm204_vm3 = vcmp.le.s32.totalorder %v203_v24, %v619_v23  ;;  %s562_s20 = smov 64   ;;  %s563_s21 = smov 80   ;;  %vm431_vm8 = vcmask 654336   ;;  %vm433_vm9 = vcmask 785408   ;;  %vm435_vm10 = vcmask 916480  }
   0xa   :  { %v334_v0 = vunpack.c.0.s8 %v333_v60  ;;  %s564_s22 = smov [#allocation2]  }
   0xb   :  { %476 = vmatpush3.bf16.xpose.msra.mxu0 %v49_v4  ;;  %v365_v4 = vunpack.c.0.s8 %v364_v63  ;;  %s444_s23 = sshll.u32 %s564_s22, 4  ;;  %s445_s23 = int_to_ptr.vmem [resolvable:$true] %s444_s23 }
   0xc   :  { %477 = vmatprep.subr.bf16.mxu0 %v553_v1  ;;  %v337_v5 = vsub.s32 %v334_v0, %v619_v23  ;;  %s531_s24 = scalar_lea.vmem %s445_s23, 32  ;;  %p536_p1 = scmp.lt.s32.totalorder %s445_s23, %s445_s23 }
   0xd   :  { %p532_p0 = scmp.ne.s32.totalorder %s445_s23, %s531_s24  ;;  %p537_p2 = scmp.lt.s32.totalorder %s531_s24, %s531_s24 }
   0xf   :  { %p538_p3 = por %p537_p2, %p536_p1 }
  0x11   :  { %p539_p4 = pnand %p538_p3, %p532_p0 }
  0x13   :  { %478 = vmatpush3.bf16.xpose.msra.mxu0 %v46_v6 }
  0x14   :  { %501 = vmatprep.subr.bf16.mxu0 %v553_v1 }
  0x1a   :  { %480 = vmatmul.mubr.msk.bf16.vlgmr.msra.gmra.mxu0 %vm41_vm0, %v522_v7 }
  0x1b   :  { %503 = vmatprep.mubr.msk.bf16.mxu0 %vm554_vm1, %v553_v1 }
  0xda   :  { %v88_v8 = vpop.f32.mrf.mxu0 }
  0xdb   :  { %v99_v9 = vpack.c.bf16 %v88_v8, %v88_v8  ;;  %v95_v16 = vmul.f32 0.25, %v88_v8  ;;  %v368_v8 = vsub.s32 %v365_v4, %v619_v23 }
  0xdc   :  { %v481_v10 = vpop.f32.mrf.mxu0 }
  0xdd   :  { %102 = vrot.lane.b32.xlu0 %v99_v9, %s555_s17  ;;  %v97_v18 = vpack.c.bf16 %v95_v16, %v95_v16 }
  0xde   :  { %v91_v11 = vpop.f32.mrf.mxu0 }
  0xdf   :  { %v100_v12 = vpack.c.bf16 %v91_v11, %v91_v11  ;;  %v96_v20 = vmul.f32 0.25, %v91_v11 }
  0xe0   :  { %v482_v13 = vpop.f32.mrf.mxu0 }
  0xe1   :  { %152 = vrot.lane.b32.xlu0 %v100_v12, %s555_s17  ;;  %v98_v21 = vpack.c.bf16 %v96_v20, %v96_v20 }
 0x14f   :  { %v103_v14 = vpop.permute.xlu0 %102 }
 0x150   :  { %v109_v15 = vsel %vm104_vm2, %v103_v14, 0 }
 0x151   :  { %484 = vmatpush3.bf16.xpose.msra.mxu1 %v109_v15 }
 0x152   :  { %489 = vmatprep.subr.bf16.mxu1 %v553_v1 }
 0x153   :  { %v153_v17 = vpop.permute.xlu0 %152 }
 0x154   :  { %v158_v19 = vsel %vm104_vm2, %v153_v17, 0 }
 0x158   :  { %486 = vmatmul.mubr.msk.bf16.vlgmr.msra.gmra.mxu1 %vm104_vm2, %v97_v18 }
 0x159   :  { %490 = vmatpush3.bf16.xpose.msra.mxu1 %v158_v19  ;;  %491 = vmatprep.mubr.msk.bf16.mxu1 %vm554_vm1, %v553_v1 }
 0x15a   :  { %495 = vmatprep.subr.bf16.mxu1 %v553_v1 }
 0x160   :  { %492 = vmatmul.mubr.msk.bf16.vlgmr.msra.gmra.mxu1 %vm104_vm2, %v98_v21 }
 0x161   :  { %497 = vmatprep.mubr.msk.bf16.mxu1 %vm554_vm1, %v553_v1 }
 0x218   :  { %v145_v25 = vpop.f32.mrf.mxu1 }
 0x219   :  { %v207_v26 = vsel %vm204_vm3, %v145_v25, -1e+30 }
 0x21a   :  { %v487_v27 = vpop.f32.mrf.mxu1  ;;  %v210_v28 = vsel %vm209_vm4, %v207_v26, -inf }
 0x21b   :  { %211 = vmax.xlane.f32.xlu1 %v210_v28 }
 0x21c   :  { %v148_v29 = vpop.f32.mrf.mxu1 }
 0x21e   :  { %v488_v30 = vpop.f32.mrf.mxu1 }
 0x220   :  { %v194_v31 = vpop.f32.mrf.mxu1 }
 0x221   :  { %v208_v32 = vsel %vm204_vm3, %v194_v31, -1e+30 }
 0x222   :  { %v493_v33 = vpop.f32.mrf.mxu1  ;;  %v213_v34 = vsel %vm209_vm4, %v208_v32, -inf }
 0x223   :  { %214 = vmax.xlane.f32.xlu1 %v213_v34 }
 0x224   :  { %v197_v35 = vpop.f32.mrf.mxu1 }
 0x226   :  { %v494_v36 = vpop.f32.mrf.mxu1 }
 0x234   :  { %234 = vrot.lane.b32.xlu1 %v99_v9, %s556_s0 }
 0x2a4   :  { %v212_v37 = vpop.xlane.xlu1 %211 }
 0x2a5   :  { %v216_v38 = vsub.f32 %v207_v26, %v212_v37 }
 0x2a7   :  { %v218_v39 = vmul.f32 1.442695, %v216_v38 }
 0x2a9   :  { %523 = vpow2.f32 %v218_v39 }
 0x2ac   :  { %v215_v40 = vpop.xlane.xlu1 %214 }
 0x2ad   :  { %v217_v41 = vsub.f32 %v208_v32, %v215_v40 }
 0x2af   :  { %v220_v42 = vmul.f32 1.442695, %v217_v41 }
 0x2b0   :  { %v235_v43 = vpop.permute.xlu1 %234 }
 0x2b1   :  { %525 = vpow2.f32 %v220_v42  ;;  %v241_v44 = vsel %vm239_vm5, %v235_v43, 0 }
 0x2b2   :  { %496 = vmatpush3.bf16.msra.mxu1 %v241_v44 }
 0x2b6   :  { %v524_v45 = vpop.eup %523 }
 0x2b7   :  { %v222_v46 = vsel %vm209_vm4, %v524_v45, 0.0 }
 0x2b8   :  { %223 = vadd.xlane.f32.xlu0 %v222_v46 }
 0x2be   :  { %v526_v47 = vpop.eup %525 }
 0x2bf   :  { %v225_v48 = vsel %vm209_vm4, %v526_v47, 0.0 }
 0x2c0   :  { %226 = vadd.xlane.f32.xlu1 %v225_v48 }
 0x2d1   :  { %283 = vrot.lane.b32.xlu1 %v100_v12, %s556_s0 }
 0x341   :  { %v224_v49 = vpop.xlane.xlu0 %223 }
 0x342   :  { %527 = vrcp.f32 %v224_v49 }
 0x349   :  { %v227_v50 = vpop.xlane.xlu1 %226 }
 0x34a   :  { %529 = vrcp.f32 %v227_v50 }
 0x34d   :  { %v284_v51 = vpop.permute.xlu1 %283 }
 0x34e   :  { %v289_v52 = vsel %vm239_vm5, %v284_v51, 0 }
 0x34f   :  { %v528_v53 = vpop.eup %527  ;;  %502 = vmatpush3.bf16.msra.mxu0 %v289_v52 }
 0x350   :  { %v230_v54 = vmul.f32 %v528_v53, %v524_v45 }
 0x352   :  { %v232_v55 = vpack.c.bf16 %v230_v54, %v230_v54 }
 0x354   :  { %498 = vmatmul.mubr.msk.bf16.vlgmr.msra.gmra.mxu1 %vm209_vm4, %v232_v55 }
 0x357   :  { %v530_v56 = vpop.eup %529 }
 0x358   :  { %v231_v57 = vmul.f32 %v530_v56, %v526_v47 }
 0x35a   :  { %v233_v58 = vpack.c.bf16 %v231_v57, %v231_v57 }
 0x35c   :  { %504 = vmatmul.mubr.msk.bf16.vlgmr.msra.gmra.mxu0 %vm209_vm4, %v233_v58 }
 0x414   :  { %v277_v61 = vpop.f32.mrf.mxu1 }
 0x415   :  { %v338_v9 = vrot.slane %v277_v61, %v337_v5  ;;  %v331_v13 = vcombine.high %v277_v61, %v553_v1 }
 0x416   :  { %v499_v2 = vpop.f32.mrf.mxu1 }
 0x417   :  { %v345_v21 = vrot.slane %v331_v13, %v337_v5 }
 0x418   :  { %v280_v3 = vpop.f32.mrf.mxu1 }
 0x41a   :  { %v500_v6 = vpop.f32.mrf.mxu1 }
 0x41c   :  { %v325_v7 = vpop.f32.mrf.mxu0 }
 0x41d   :  { %v346_v10 = vcombine.high %v325_v7, %v553_v1  ;;  %v353_v11 = vrot.slane %v325_v7, %v337_v5 }
 0x41e   :  { %v505_v12 = vpop.f32.mrf.mxu0 }
 0x41f   :  { %v361_v14 = vcombine.low %v338_v9, %v353_v11  ;;  %v362_v15 = vcombine.high %v338_v9, %v353_v11  ;;  %v360_v17 = vrot.slane %v346_v10, %v337_v5 }
 0x420   :  { %v328_v16 = vpop.f32.mrf.mxu0 }
 0x421   :  { %v369_v18 = vrot.slane %v361_v14, %v368_v8  ;;  %v376_v19 = vrot.slane %v362_v15, %v368_v8  ;;  %v377_v23 = vcombine.low %v345_v21, %v360_v17  ;;  %v378_v25 = vcombine.high %v345_v21, %v360_v17 }
 0x422   :  { %v506_v20 = vpop.f32.mrf.mxu0 }
 0x423   :  { %402 = vrot.lane.b32.xlu1 %v376_v19, %s559_s1  ;;  %v394_v22 = vcombine.high %v376_v19, %v553_v1  ;;  %v393_v24 = vcombine.high %v369_v18, %v553_v1  ;;  %v385_v26 = vrot.slane %v377_v23, %v368_v8  ;;  %v392_v27 = vrot.slane %v378_v25, %v368_v8 }
 0x425   :  { %406 = vrot.lane.b32.xlu0 %v394_v22, %s560_s18  ;;  %v395_v28 = vcombine.high %v385_v26, %v553_v1  ;;  %v396_v29 = vcombine.high %v392_v27, %v553_v1 }
 0x427   :  { %398 = vrot.lane.b32.xlu1 %v393_v24, %s561_s19 }
 0x42b   :  { %410 = vrot.lane.b32.xlu1 %v385_v26, %s562_s20 }
 0x42f   :  { %418 = vrot.lane.b32.xlu1 %v392_v27, %s556_s0 }
 0x433   :  { %414 = vrot.lane.b32.xlu1 %v395_v28, %s563_s21 }
 0x437   :  { %422 = vrot.lane.b32.xlu1 %v396_v29, %s555_s17 }
 0x495   :  { %v403_v30 = vpop.permute.xlu1 %402 }
 0x497   :  { %v407_v35 = vpop.permute.xlu0 %406 }
 0x499   :  { %v399_v31 = vpop.permute.xlu1 %398 }
 0x49a   :  { %v425_v32 = vsel %vm104_vm2, %v369_v18, %v399_v31 }
 0x49b   :  { %v426_v34 = vsel %vm41_vm0, %v425_v32, %v403_v30 }
 0x49c   :  { %v428_v37 = vsel %vm427_vm6, %v426_v34, %v407_v35 }
 0x49d   :  { %v411_v33 = vpop.permute.xlu1 %410 }
 0x49e   :  { %v430_v38 = vsel %vm429_vm7, %v428_v37, %v411_v33 }
 0x4a1   :  { %v419_v36 = vpop.permute.xlu1 %418 }
 0x4a5   :  { %v415_v39 = vpop.permute.xlu1 %414 }
 0x4a6   :  { %v432_v40 = vsel %vm431_vm8, %v430_v38, %v415_v39 }
 0x4a7   :  { %v434_v1 = vsel %vm433_vm9, %v432_v40, %v419_v36 }
 0x4a9   :  { %v423_v41 = vpop.permute.xlu1 %422 }
 0x4aa   :  { %v436_v42 = vsel %vm435_vm10, %v434_v1, %v423_v41 }
 0x4ab   :  { %437 = vst [vmem:[#allocation2] sm:$0x3] %v436_v42 }
 0x4ac   :  { %542 = shalt.err (!%p539_p4)
}
 0x4ad   :  { %447 = dma.vmem_to_hbm [thread:$0]  %s445_s23, 32, %s649_s2, [#allocation3]  }
 0x4ae   :  { %551 = dma.done.wait [#allocation3], 32  }
 0x4af   :  { %552 = vsyncadd [#allocation3], 4294967264 }
 0x4b0   :  { %451 = vsyncpa [#allocation3], 1 }

</bundles_post_ra>
